<compile_context>
chip_gen: v7x
topology: tpu7x:2x2x1
jax: 0.10.0
libtpu: 0.0.40
codegen_flags: <defaults>
</compile_context>

<pallas_src>
import functools

import jax
import jax.numpy as jnp
from jax.experimental import pallas as pl
from jax.experimental.pallas import tpu as pltpu

_NEG = -1e30  # finite "minus infinity" so padded rows/cols never produce NaN


def _round_up(x, m):
    return ((x + m - 1) // m) * m


# ------------------------------ Pallas kernel -------------------------------

def _xent_kernel(logits_ref, labels_ref, out_ref, acc_ref, *, n_valid, block_m):
    """Per-tile cross-entropy partial sum, accumulated across the grid.

    logits_ref: (block_m, C_pad) f32   labels_ref: (block_m, 1) i32
    out_ref:    (1, 1) f32             acc_ref:    (1, 1) f32 VMEM scratch
    """
    i = pl.program_id(0)

    @pl.when(i == 0)
    def _init():
        acc_ref[...] = jnp.zeros_like(acc_ref)

    x = logits_ref[...]                                          # (tm, Cp) f32
    lbl = labels_ref[...]                                        # (tm, 1)  i32

    # row-wise logsumexp (numerically stable)
    m = jnp.max(x, axis=-1, keepdims=True)                       # (tm, 1)
    lse = m + jnp.log(jnp.sum(jnp.exp(x - m), axis=-1, keepdims=True))

    # gather x[r, lbl[r]] without a gather op: one-hot mask from a lane iota
    cls = jax.lax.broadcasted_iota(jnp.int32, x.shape, 1)        # (tm, Cp)
    picked = jnp.sum(jnp.where(cls == lbl, x, 0.0), axis=-1, keepdims=True)

    # mask rows that are only padding (global row index >= n_valid)
    rows = i * block_m + jax.lax.broadcasted_iota(jnp.int32, (x.shape[0], 1), 0)
    valid = (rows < n_valid).astype(jnp.float32)                 # (tm, 1)

    per_row = (lse - picked) * valid                             # (tm, 1)
    acc_ref[...] += jnp.sum(per_row, axis=0, keepdims=True)      # (1, 1)

    @pl.when(i == pl.num_programs(0) - 1)
    def _finalize():
        out_ref[...] = acc_ref[...] * jnp.float32(1.0 / n_valid)  # 'mean' reduction


# ------------------------------ wrapper (forward) ----------------------------

def xent_wrapper_forward(y_hat, y):
    """Equivalent of xent_wrapper.forward: CrossEntropyLoss(y_hat, y.long())."""
    y_hat = jnp.asarray(y_hat, jnp.float32)
    y = jnp.asarray(y)

    # torch CE also accepts (N, C, d1, ...) logits with (N, d1, ...) targets:
    # flatten the spatial dims so the kernel always sees (rows, classes).
    if y_hat.ndim > 2:
        c = y_hat.shape[1]
        y_hat = jnp.moveaxis(y_hat, 1, -1).reshape(-1, c)
        y = y.reshape(-1)

    n, c = y_hat.shape
    labels = y.astype(jnp.int32).reshape(n, 1)                   # y.type(torch.long)

    # lane-dense class axis, row tile sized so the double-buffered logits tile
    # stays ~<=16 MiB (safe on v5e/v6e 128 MiB and v7x 64 MiB VMEM).
    c_pad = _round_up(c, 128)
    tile_budget_bytes = 16 * 1024 * 1024
    block_m = tile_budget_bytes // (2 * c_pad * 4)
    block_m = max(8, min(block_m, 1024, _round_up(n, 8)))
    block_m = max(8, (block_m // 8) * 8)
    n_pad = _round_up(n, block_m)

    logits_p = jnp.pad(y_hat, ((0, n_pad - n), (0, c_pad - c)), constant_values=_NEG)
    labels_p = jnp.pad(labels, ((0, n_pad - n), (0, 0)), constant_values=0)

    grid = (n_pad // block_m,)
    kern = functools.partial(_xent_kernel, n_valid=n, block_m=block_m)

    out = pl.pallas_call(
        kern,
        out_shape=jax.ShapeDtypeStruct((1, 1), jnp.float32),
        grid_spec=pltpu.PrefetchScalarGridSpec(
            num_scalar_prefetch=0,
            grid=grid,
            in_specs=[
                pl.BlockSpec((block_m, c_pad), lambda i: (i, 0)),
                pl.BlockSpec((block_m, 1), lambda i: (i, 0)),
            ],
            out_specs=pl.BlockSpec((1, 1), lambda i: (0, 0)),
            scratch_shapes=[pltpu.VMEM((1, 1), jnp.float32)],
        ),
        compiler_params=pltpu.CompilerParams(
            dimension_semantics=("arbitrary",),          # reduction axis
            vmem_limit_bytes=48 * 1024 * 1024,
        ),
        cost_estimate=pl.CostEstimate(
            flops=6 * n_pad * c_pad,
            transcendentals=n_pad * c_pad + n_pad,
            bytes_accessed=4 * (n_pad * c_pad + n_pad + 1),
        ),
    )(logits_p, labels_p)
    return out[0, 0]


# ---------------------------------- main -------------------------------------

if __name__ == "__main__":
    key = jax.random.PRNGKey(0)
    k1, k2 = jax.random.split(key)

    n, c = 32, 10
    y_hat = jax.random.normal(k1, (n, c), jnp.float32)
    # targets arrive as float (the torch wrapper casts with .type(torch.long))
    y = jax.random.randint(k2, (n,), 0, c).astype(jnp.float32)

    loss = jax.jit(xent_wrapper_forward)(y_hat, y)
    loss = jax.block_until_ready(loss)

    # pure-JAX reference
    yi = y.astype(jnp.int32)
    ref = jnp.mean(jax.nn.logsumexp(y_hat, axis=-1)
                   - jnp.take_along_axis(y_hat, yi[:, None], axis=-1)[:, 0])
    assert loss.shape == ()
    assert jnp.allclose(loss, ref, atol=1e-5, rtol=1e-5), (float(loss), float(ref))
    print("KERNEL_OK")
</pallas_src>

<mosaic_0001>
module attributes {stable_mosaic.version = 11 : i64} {
  func.func @_xent_kernel(%arg0: i32, %arg1: memref<32x128xf32, #tpu.memory_space<vmem>>, %arg2: memref<32x1xi32, #tpu.memory_space<vmem>>, %arg3: memref<1x1xf32, #tpu.memory_space<vmem>>, %arg4: memref<1x1xf32, #tpu.memory_space<vmem>>) attributes {dimension_semantics = [#tpu.dimension_semantics<arbitrary>], iteration_bounds = array<i64: 1>, scalar_prefetch = 0 : i64, scratch_operands = 1 : i64, tpu.core_type = #tpu.core_type<tc>, window_params = [{transform_indices = @transform_0, window_bounds = array<i64: 32, 128>}, {transform_indices = @transform_1, window_bounds = array<i64: 32, 1>}, {pipeline_mode = #tpu.pipeline_mode<synchronous>, transform_indices = @transform_2, window_bounds = array<i64: 1, 1>}]} {
    %c0_i32 = arith.constant 0 : i32
    %0 = arith.cmpi eq, %arg0, %c0_i32 : i32
    %1 = arith.extui %0 : i1 to i32
    %c0_i32_0 = arith.constant 0 : i32
    %2 = arith.cmpi ne, %1, %c0_i32_0 : i32
    scf.if %2 {
      %cst_15 = arith.constant 0.000000e+00 : f32
      %39 = vector.broadcast %cst_15 : f32 to vector<1x1xf32>
      %c0_16 = arith.constant 0 : index
      %c0_17 = arith.constant 0 : index
      %40 = vector.load %arg4[%c0_16, %c0_17] : memref<1x1xf32, #tpu.memory_space<vmem>>, vector<1x1xf32>
      tpu.vector_store %arg4[%c0_16, %c0_17], %39 {strides = array<i32>} : memref<1x1xf32, #tpu.memory_space<vmem>>, vector<1x1xf32>,
    } else {
    }
    %c0 = arith.constant 0 : index
    %c0_1 = arith.constant 0 : index
    %3 = vector.load %arg1[%c0, %c0_1] : memref<32x128xf32, #tpu.memory_space<vmem>>, vector<32x128xf32>
    %c0_2 = arith.constant 0 : index
    %c0_3 = arith.constant 0 : index
    %4 = vector.load %arg2[%c0_2, %c0_3] : memref<32x1xi32, #tpu.memory_space<vmem>>, vector<32x1xi32>
    %cst = arith.constant dense<0xFF800000> : vector<32xf32>
    %5 = vector.multi_reduction <maximumf>, %3, %cst [1] : vector<32x128xf32> to vector<32xf32>
    %6 = vector.shape_cast %5 : vector<32xf32> to vector<32x1xf32>
    %7 = vector.broadcast %6 : vector<32x1xf32> to vector<32x128xf32>
    %8 = arith.subf %3, %7 : vector<32x128xf32>
    %9 = math.exp %8 : vector<32x128xf32>
    %cst_4 = arith.constant dense<0.000000e+00> : vector<32xf32>
    %10 = vector.multi_reduction <add>, %9, %cst_4 [1] : vector<32x128xf32> to vector<32xf32>
    %11 = vector.shape_cast %10 : vector<32xf32> to vector<32x1xf32>
    %12 = math.log %11 : vector<32x1xf32>
    %13 = arith.addf %6, %12 : vector<32x1xf32>
    %14 = tpu.iota {dimensions = array<i32: 1>} : vector<32x128xi32>
    %15 = vector.broadcast %4 : vector<32x1xi32> to vector<32x128xi32>
    %16 = arith.cmpi eq, %14, %15 : vector<32x128xi32>
    %cst_5 = arith.constant 0.000000e+00 : f32
    %17 = vector.broadcast %cst_5 : f32 to vector<32x128xf32>
    %18 = arith.select %16, %3, %17 : vector<32x128xi1>, vector<32x128xf32>
    %cst_6 = arith.constant dense<0.000000e+00> : vector<32xf32>
    %19 = vector.multi_reduction <add>, %18, %cst_6 [1] : vector<32x128xf32> to vector<32xf32>
    %20 = vector.shape_cast %19 : vector<32xf32> to vector<32x1xf32>
    %c32_i32 = arith.constant 32 : i32
    %21 = arith.muli %arg0, %c32_i32 : i32
    %22 = tpu.iota {dimensions = array<i32: 0>} : vector<32x1xi32>
    %23 = vector.broadcast %21 : i32 to vector<32x1xi32>
    %24 = arith.addi %23, %22 : vector<32x1xi32>
    %c32_i32_7 = arith.constant 32 : i32
    %25 = vector.broadcast %c32_i32_7 : i32 to vector<32x1xi32>
    %26 = arith.cmpi slt, %24, %25 : vector<32x1xi32>
    %27 = arith.extui %26 : vector<32x1xi1> to vector<32x1xi32>
    %28 = arith.sitofp %27 : vector<32x1xi32> to vector<32x1xf32>
    %29 = arith.subf %13, %20 : vector<32x1xf32>
    %30 = arith.mulf %29, %28 : vector<32x1xf32>
    %c0_8 = arith.constant 0 : index
    %c0_9 = arith.constant 0 : index
    %31 = vector.load %arg4[%c0_8, %c0_9] : memref<1x1xf32, #tpu.memory_space<vmem>>, vector<1x1xf32>
    %cst_10 = arith.constant dense<0.000000e+00> : vector<1xf32>
    %32 = vector.multi_reduction <add>, %30, %cst_10 [0] : vector<32x1xf32> to vector<1xf32>
    %33 = vector.shape_cast %32 : vector<1xf32> to vector<1x1xf32>
    %34 = arith.addf %31, %33 : vector<1x1xf32>
    %c0_11 = arith.constant 0 : index
    %c0_12 = arith.constant 0 : index
    %35 = vector.load %arg4[%c0_11, %c0_12] : memref<1x1xf32, #tpu.memory_space<vmem>>, vector<1x1xf32>
    tpu.vector_store %arg4[%c0_11, %c0_12], %34 {strides = array<i32>} : memref<1x1xf32, #tpu.memory_space<vmem>>, vector<1x1xf32>,
    %c0_i32_13 = arith.constant 0 : i32
    %36 = arith.cmpi eq, %arg0, %c0_i32_13 : i32
    %37 = arith.extui %36 : i1 to i32
    %c0_i32_14 = arith.constant 0 : i32
    %38 = arith.cmpi ne, %37, %c0_i32_14 : i32
    scf.if %38 {
      %c0_15 = arith.constant 0 : index
      %c0_16 = arith.constant 0 : index
      %39 = vector.load %arg4[%c0_15, %c0_16] : memref<1x1xf32, #tpu.memory_space<vmem>>, vector<1x1xf32>
      %cst_17 = arith.constant 3.125000e-02 : f32
      %40 = vector.broadcast %cst_17 : f32 to vector<1x1xf32>
      %41 = arith.mulf %39, %40 : vector<1x1xf32>
      %c0_18 = arith.constant 0 : index
      %c0_19 = arith.constant 0 : index
      %42 = vector.load %arg3[%c0_18, %c0_19] : memref<1x1xf32, #tpu.memory_space<vmem>>, vector<1x1xf32>
      tpu.vector_store %arg3[%c0_18, %c0_19], %41 {strides = array<i32>} : memref<1x1xf32, #tpu.memory_space<vmem>>, vector<1x1xf32>,
    } else {
    }
    return
  }
  func.func @transform_0(%arg0: i32) -> (i32, i32) {
    %c0_i32 = arith.constant 0 : i32
    %c0_i32_0 = arith.constant 0 : i32
    return %arg0, %c0_i32 : i32, i32
  }
  func.func @transform_1(%arg0: i32) -> (i32, i32) {
    %c0_i32 = arith.constant 0 : i32
    %c0_i32_0 = arith.constant 0 : i32
    return %arg0, %c0_i32 : i32, i32
  }
  func.func @transform_2(%arg0: i32) -> (i32, i32) {
    %c0_i32 = arith.constant 0 : i32
    %c0_i32_0 = arith.constant 0 : i32
    %c0_i32_1 = arith.constant 0 : i32
    return %c0_i32, %c0_i32_0 : i32, i32
  }
}

</mosaic_0001>

<bundles_post_ra>
// kernel: xent_wrapper_forward.1
= control target key start
LH: loop header
LB: loop body
LE: loop exit
PB: predicated region body
PF: predicated region fallthrough
CT: control target
= control target key end

     0   :  { %v205_v4 = vmov 0   ;;  %s262_s0 = inlined_call_operand.vmem [shape: f32[32,128], index: 0, kind: input, shape index: {}]   ;;  %s263_s1 = inlined_call_operand.vmem [shape: s32[32,1], index: 1, kind: input, shape index: {}]   ;;  %s264_s2 = inlined_call_operand.hbm [shape: f32[1,1], index: 2, kind: output, shape index: {}]  }
   0x1   :  { %v18_v0 = vld [vmem:[%s262_s0] sm:$0xff]  ;;  %v20_v1 = vld [vmem:[%s262_s0 + $0x10] sm:$0xff]  ;;  %v19_v2 = vld [vmem:[%s262_s0 + $0x8] sm:$0xff]  ;;  %164 = vset.pattern.permute.xlu1 %v205_v4  ;;  %163 = vset.pattern.permute.xlu0 %v205_v4 }
   0x2   :  { %26 = vmax.xlane.f32.xlu0 %v18_v0  ;;  %30 = vmax.xlane.f32.xlu1 %v20_v1  ;;  %v21_v3 = vld [vmem:[%s262_s0 + $0x18] sm:$0xff] }
   0x3   :  { %7 = vsyncpa [#allocation4], 0  ;;  %v23_v5 = vld [vmem:[%s263_s1 + $0x8] sm:$0xff]  ;;  %v24_v6 = vld [vmem:[%s263_s1 + $0x10] sm:$0xff]  ;;  %v66_v22 = vlaneseq  ;;  %vm16_vm4 = vcmask 0   ;;  %v206_v35 = vmov 0.0  }
   0x4   :  { %v22_v7 = vld [vmem:[%s263_s1] sm:$0xff]  ;;  %v25_v8 = vld [vmem:[%s263_s1 + $0x18] sm:$0xff]  ;;  %17 = vst.msk [vmem:[#allocation2] sm:$0x1] %vm16_vm4, %v206_v35  ;;  %s207_s1 = smov [#allocation3]  }
   0x5   :  { %v67_v24 = vand.u32 127, %v66_v22  ;;  %s152_s24 = sshll.u32 %s207_s1, 4  ;;  %s153_s24 = int_to_ptr.vmem [resolvable:$true] %s152_s24 }
   0x6   :  { %28 = vmax.xlane.f32.xlu0 %v19_v2  ;;  %32 = vmax.xlane.f32.xlu1 %v21_v3  ;;  %s181_s25 = scalar_lea.vmem %s153_s24, 16  ;;  %s185_s26 = scalar_lea.vmem %s153_s24, 32 }
   0x7   :  { %p182_p0 = scmp.ne.s32.totalorder %s153_s24, %s181_s25  ;;  %p186_p1 = scmp.lt.s32.totalorder %s153_s24, %s153_s24 }
   0x8   :  { %p187_p2 = scmp.lt.s32.totalorder %s185_s26, %s181_s25 }
   0xa   :  { %p188_p3 = por %p187_p2, %p186_p1 }
   0xb   :  { %v127_v4 = vld [vmem:[#allocation2] sm:$0x1] }
   0xc   :  { %p189_p4 = pnand %p188_p3, %p182_p0 }
  0x17   :  { %72 = vperm.xlu1 %164, %v23_v5  }
  0x1b   :  { %75 = vperm.xlu1 %164, %v24_v6  }
  0x1c   :  { %69 = vperm.xlu0 %163, %v22_v7  }
  0x1f   :  { %78 = vperm.xlu1 %164, %v25_v8  }
  0x8f   :  { %v27_v9 = vpop.xlane.xlu0 %26  ;;  %v31_v10 = vpop.xlane.xlu1 %30 }
  0x90   :  { %v34_v11 = vsub.f32 %v18_v0, %v27_v9  ;;  %v36_v12 = vsub.f32 %v20_v1, %v31_v10 }
  0x92   :  { %v38_v13 = vmul.f32 1.442695, %v34_v11  ;;  %v42_v14 = vmul.f32 1.442695, %v36_v12 }
  0x93   :  { %v29_v15 = vpop.xlane.xlu0 %28  ;;  %v33_v16 = vpop.xlane.xlu1 %32 }
  0x94   :  { %165 = vpow2.f32 %v38_v13  ;;  %v35_v17 = vsub.f32 %v19_v2, %v29_v15  ;;  %v37_v18 = vsub.f32 %v21_v3, %v33_v16 }
  0x95   :  { %167 = vpow2.f32 %v42_v14 }
  0x96   :  { %v40_v19 = vmul.f32 1.442695, %v35_v17  ;;  %v44_v20 = vmul.f32 1.442695, %v37_v18 }
  0x97   :  { %v73_v21 = vpop.permute.xlu1 %72 }
  0x98   :  { %169 = vpow2.f32 %v40_v19  ;;  %vm81_vm2 = vcmp.eq.s32.totalorder %v67_v24, %v73_v21 }
  0x99   :  { %171 = vpow2.f32 %v44_v20  ;;  %v85_v33 = vsel %vm81_vm2, %v19_v2, 0.0 }
  0x9b   :  { %v76_v26 = vpop.permute.xlu1 %75  ;;  %v70_v28 = vpop.permute.xlu0 %69 }
  0x9c   :  { %vm82_vm0 = vcmp.eq.s32.totalorder %v67_v24, %v76_v26  ;;  %vm80_vm1 = vcmp.eq.s32.totalorder %v67_v24, %v70_v28 }
  0x9d   :  { %v86_v30 = vsel %vm82_vm0, %v20_v1, 0.0  ;;  %v84_v31 = vsel %vm80_vm1, %v18_v0, 0.0 }
  0x9e   :  { %v166_v23 = vpop.eup %165 }
  0x9f   :  { %46 = vadd.xlane.f32.xlu1 %v166_v23  ;;  %v168_v25 = vpop.eup %167  ;;  %v79_v32 = vpop.permute.xlu1 %78 }
  0xa0   :  { %vm83_vm3 = vcmp.eq.s32.totalorder %v67_v24, %v79_v32 }
  0xa1   :  { %v87_v34 = vsel %vm83_vm3, %v21_v3, 0.0 }
  0xa2   :  { %v170_v27 = vpop.eup %169 }
  0xa3   :  { %50 = vadd.xlane.f32.xlu1 %v168_v25  ;;  %48 = vadd.xlane.f32.xlu0 %v170_v27  ;;  %v172_v29 = vpop.eup %171 }
  0xa7   :  { %52 = vadd.xlane.f32.xlu1 %v172_v29  ;;  %92 = vadd.xlane.f32.xlu0 %v86_v30 }
  0xab   :  { %88 = vadd.xlane.f32.xlu1 %v84_v31 }
  0xaf   :  { %90 = vadd.xlane.f32.xlu1 %v85_v33 }
  0xb3   :  { %94 = vadd.xlane.f32.xlu1 %v87_v34 }
 0x12c   :  { %v47_v36 = vpop.xlane.xlu1 %46 }
 0x12d   :  { %173 = vlog2.f32 %v47_v36 }
 0x130   :  { %v51_v37 = vpop.xlane.xlu1 %50  ;;  %v49_v38 = vpop.xlane.xlu0 %48 }
 0x131   :  { %175 = vlog2.f32 %v51_v37 }
 0x132   :  { %177 = vlog2.f32 %v49_v38 }
 0x134   :  { %v53_v39 = vpop.xlane.xlu1 %52  ;;  %v93_v55 = vpop.xlane.xlu0 %92 }
 0x135   :  { %179 = vlog2.f32 %v53_v39 }
 0x137   :  { %v174_v40 = vpop.eup %173 }
 0x138   :  { %v89_v41 = vpop.xlane.xlu1 %88  ;;  %v55_v42 = vmul.f32 0.6931472, %v174_v40 }
 0x13a   :  { %v62_v47 = vadd.f32 %v55_v42, %v27_v9 }
 0x13b   :  { %v176_v43 = vpop.eup %175 }
 0x13c   :  { %v178_v44 = vpop.eup %177  ;;  %v59_v45 = vmul.f32 0.6931472, %v176_v43  ;;  %v91_v48 = vpop.xlane.xlu1 %90  ;;  %v119_v53 = vsub.f32 %v62_v47, %v89_v41 }
 0x13d   :  { %v57_v46 = vmul.f32 0.6931472, %v178_v44 }
 0x13e   :  { %v64_v50 = vadd.f32 %v59_v45, %v31_v10 }
 0x13f   :  { %v180_v49 = vpop.eup %179  ;;  %v63_v51 = vadd.f32 %v57_v46, %v29_v15 }
 0x140   :  { %v61_v52 = vmul.f32 0.6931472, %v180_v49  ;;  %v121_v57 = vsub.f32 %v64_v50, %v93_v55  ;;  %v95_v59 = vpop.xlane.xlu1 %94 }
 0x141   :  { %v120_v54 = vsub.f32 %v63_v51, %v91_v48 }
 0x142   :  { %v65_v56 = vadd.f32 %v61_v52, %v33_v16 }
 0x143   :  { %v128_v58 = vadd.f32 %v120_v54, %v119_v53 }
 0x144   :  { %v122_v60 = vsub.f32 %v65_v56, %v95_v59 }
 0x145   :  { %v129_v61 = vadd.f32 %v128_v58, %v121_v57 }
 0x147   :  { %v130_v62 = vadd.f32 %v129_v61, %v122_v60 }
 0x149   :  { %v131_v63 = vrot.slane %v130_v62, 4 }
 0x14b   :  { %v132_v0 = vadd.f32 %v131_v63, %v130_v62 }
 0x14d   :  { %v133_v1 = vrot.slane %v132_v0, 2 }
 0x14f   :  { %v134_v2 = vadd.f32 %v133_v1, %v132_v0 }
 0x151   :  { %v135_v3 = vrot.slane %v134_v2, 1 }
 0x153   :  { %v136_v5 = vadd.f32 %v135_v3, %v134_v2 }
 0x155   :  { %v137_v6 = vadd.f32 %v136_v5, %v127_v4 }
 0x157   :  { %139 = vst.msk [vmem:[#allocation2] sm:$0x1] %vm16_vm4, %v137_v6 }
 0x15e   :  { %v143_v7 = vld [vmem:[#allocation2] sm:$0x1] }
 0x15f   :  { %v144_v8 = vmul.f32 0.03125, %v143_v7 }
 0x161   :  { %145 = vst.msk [vmem:[#allocation3] sm:$0x1] %vm16_vm4, %v144_v8 }
 0x162   :  { %192 = shalt.err (!%p189_p4)
}
 0x163   :  { %s193_s29 = scalar_lea.hbm %s264_s2, 16 }
 0x164   :  { %p194_p5 = scmp.ne.s32.totalorder %s264_s2, %s193_s29  ;;  %p197_p6 = scmp.lt.u32.totalorder %s193_s29, %s264_s2 }
 0x166   :  { %p199_p7 = pnand %p197_p6, %p194_p5 }
 0x168   :  { %202 = shalt.err (!%p199_p7)
}
 0x169   :  { %155 = dma.vmem_to_hbm [thread:$0]  %s153_s24, 16, %s264_s2, [#allocation4]  }
 0x16a   :  { %203 = dma.done.wait [#allocation4], 16  }
 0x16b   :  { %204 = vsyncadd [#allocation4], 4294967280 }
 0x16c   :  { %159 = vsyncpa [#allocation4], 1 }

</bundles_post_ra>
